<compile_context>
chip_gen: v7x
topology: tpu7x:2x2x1
jax: 0.10.0
libtpu: 0.0.40
codegen_flags: <defaults>
</compile_context>

<pallas_src>
import functools

import jax
import jax.numpy as jnp
import numpy as np
from jax.experimental import pallas as pl
from jax.experimental.pallas import tpu as pltpu


def _routing_constants(depth, n_tree):
    """Per-level routing matrices A_l and biases c_l (built once, off the hot path).

    For leaf j of a tree at level l the internal node used is
    node = 2**l + (j >> (depth-l)) and the branch bit is
    bit = (j >> (depth-l-1)) & 1  (1 -> take 1-d).  The per-level factor is
        factor = d @ A_l + c_l,   A_l[node, j] = 1 - 2*bit,  c_l[j] = bit,
    replicated block-diagonally across the n_tree lane groups."""
    L = 2 ** depth
    TL = n_tree * L
    A = np.zeros((depth, TL, TL), np.float32)
    c = np.zeros((depth, 1, TL), np.float32)
    for l in range(depth):
        for j in range(L):
            node = 2 ** l + (j >> (depth - l))
            bit = (j >> (depth - l - 1)) & 1
            for t in range(n_tree):
                A[l, t * L + node, t * L + j] = 1.0 - 2.0 * bit
                c[l, 0, t * L + j] = float(bit)
    return A, c


def _forest_kernel(x_ref, w_ref, b_ref, ra_ref, rc_ref, pi_ref, out_ref, *,
                   depth, tl):
    """One batch tile; all trees (and 4 packed batch rows) fused on the lane axis."""
    # Decision layer: bf16 x / bf16 fused weights, f32 MXU accumulation.
    logits = jnp.dot(x_ref[...], w_ref[...],
                     preferred_element_type=jnp.float32) + b_ref[...]
    d = jax.nn.sigmoid(logits)                               # (TB, tl) f32

    # Leaf routing: product over levels of (d @ A_l + c_l).  A_l is a +/-1
    # selection matrix (exact in f32); the "1 - d" branch is folded into the
    # sign and the constant bias.
    rc = rc_ref[...]                                         # (depth, tl)
    mu = jnp.dot(d, ra_ref[0:tl, :],
                 preferred_element_type=jnp.float32) + rc[0:1, :]
    for l in range(1, depth):
        mu = mu * (jnp.dot(d, ra_ref[l * tl:(l + 1) * tl, :],
                           preferred_element_type=jnp.float32) + rc[l:l + 1, :])

    # pi is block-diagonal per packed row and pre-scaled by 1/n_tree, so this
    # single matmul already yields the mean over trees.
    out_ref[...] = jnp.dot(mu, pi_ref[...], preferred_element_type=jnp.float32)


def prepare_forest(feature_mask, w, b, pi, depth):
    """One-time parameter preprocessing (hoisted out of the forward path)."""
    n_tree, F, U = feature_mask.shape
    L = 2 ** depth
    C = pi.shape[-1]
    TL = n_tree * L

    # Fold the one-hot feature selection into the decision weights and
    # lane-concatenate all trees: (F, n_tree*L).
    eff_w = jnp.einsum('tfu,tul->tfl', feature_mask, w)          # (n_tree, F, L)
    w_cat = jnp.transpose(eff_w, (1, 0, 2)).reshape(F, TL).astype(jnp.float32)
    b_cat = b.reshape(1, TL).astype(jnp.float32)
    pi_cat = (pi.astype(jnp.float32) / n_tree).reshape(TL, C)    # pre-scaled mean

    # Pack P batch rows per 128-lane group via block-diagonal constants so the
    # VPU/EUP/MXU lanes are dense even for small trees (TL=32 -> 128 lanes).
    P = 1
    for cand in (4, 2):
        if cand * TL <= 128:
            P = cand
            break

    eye = jnp.eye(P, dtype=jnp.float32)
    w_pack = jnp.kron(eye, w_cat).astype(jnp.bfloat16)           # (P*F, P*TL)
    b_pack = jnp.tile(b_cat, (1, P))                             # (1, P*TL)
    pi_pack = jnp.kron(eye, pi_cat)                              # (P*TL, P*C)

    # TODO(synk): for production forests (e.g. 32 trees, depth 6-8) replace the
    # dense per-level routing matmul with structured routing (strided slices of
    # d + sign/bias on the VPU); the dense constant grows quadratically and
    # would not fit v7x's 64 MiB VMEM.
    A, c = _routing_constants(depth, n_tree)                     # numpy, one-time
    eye_np = np.eye(P, dtype=np.float32)
    ra = np.concatenate([np.kron(eye_np, A[l]) for l in range(depth)], axis=0)
    rc = np.concatenate([np.tile(c[l], (1, P)) for l in range(depth)], axis=0)

    return dict(
        depth=depth, P=P, F=F, C=C, TL=TL,
        w=w_pack,                                  # (P*F, P*TL)        bf16
        b=b_pack,                                  # (1, P*TL)          f32
        pi=pi_pack,                                # (P*TL, P*C)        f32
        route_a=jnp.asarray(ra, jnp.float32),      # (depth*P*TL, P*TL) f32
        route_c=jnp.asarray(rc, jnp.float32),      # (depth, P*TL)      f32
    )


def forest_forward(x, params):
    depth, P, F, C, TL = (params['depth'], params['P'], params['F'],
                          params['C'], params['TL'])
    Fp, TLp, Cp = P * F, P * TL, P * C
    B = x.shape[0]

    # Pad the batch to a multiple of the packing factor, pack P rows per
    # 128-lane group (free row-major reshape) and stream x as bf16 (halves HBM
    # traffic on the only operand that scales with B).
    B_pad = ((B + P - 1) // P) * P
    if B_pad != B:
        x = jnp.pad(x, ((0, B_pad - B), (0, 0)))
    Bp = B_pad // P
    x_pack = x.reshape(Bp, Fp).astype(jnp.bfloat16)

    # Batch tiling: big tiles (per-grid-step overhead dwarfs the tiny compute),
    # but give the "parallel" axis >=2 steps when the batch allows it so v7x's
    # two TensorCores both get work.  Tile sizes stay multiples of 8 sublanes.
    if Bp <= 512:
        TBp = Bp // 2 if (Bp >= 16 and Bp % 16 == 0) else Bp
    else:
        TBp = 512
    grid = (pl.cdiv(Bp, TBp),)

    kernel = functools.partial(_forest_kernel, depth=depth, tl=TLp)
    out = pl.pallas_call(
        kernel,
        out_shape=jax.ShapeDtypeStruct((Bp, Cp), jnp.float32),
        grid_spec=pltpu.PrefetchScalarGridSpec(
            num_scalar_prefetch=0,
            grid=grid,
            in_specs=[
                pl.BlockSpec((TBp, Fp), lambda i: (i, 0)),           # x tile
                pl.BlockSpec((Fp, TLp), lambda i: (0, 0)),           # fused W
                pl.BlockSpec((1, TLp), lambda i: (0, 0)),            # fused b
                pl.BlockSpec((depth * TLp, TLp), lambda i: (0, 0)),  # routing A
                pl.BlockSpec((depth, TLp), lambda i: (0, 0)),        # routing c
                pl.BlockSpec((TLp, Cp), lambda i: (0, 0)),           # stacked pi
            ],
            out_specs=pl.BlockSpec((TBp, Cp), lambda i: (i, 0)),
        ),
        compiler_params=pltpu.CompilerParams(
            dimension_semantics=("parallel",)),
    )(x_pack, params['w'], params['b'], params['route_a'],
      params['route_c'], params['pi'])

    # Un-pack the P rows-per-lane-group output and drop batch padding.
    return out.reshape(B_pad, C)[:B]


def forest_reference(x, feature_mask, w, b, pi, depth):
    """Pure-JAX transcription of the PyTorch Forest/Tree forward."""
    n_tree = feature_mask.shape[0]
    B = x.shape[0]
    preds = []
    for t in range(n_tree):
        feats = x @ feature_mask[t]
        d = jax.nn.sigmoid(feats @ w[t] + b[t, 0])            # (B, n_leaf)
        mu = jnp.ones((B, 1), jnp.float32)
        begin = 1
        for l in range(depth):
            d_layer = d[:, begin:begin + 2 ** l]              # (B, 2^l)
            left = mu * d_layer
            right = mu * (1.0 - d_layer)
            mu = jnp.stack([left, right], axis=-1).reshape(B, -1)
            begin += 2 ** l
        preds.append(mu @ pi[t])
    return sum(preds) / n_tree


if __name__ == "__main__":
    # conf: n_trees=4, tree_depth=3 (-> 8 leaves), n_class=4
    # data: 32 input features, used_feature_rate=0.5 (-> 16 used features)
    n_tree, depth, n_class = 4, 3, 4
    B, F, U = 8, 32, 16
    L = 2 ** depth

    key = jax.random.PRNGKey(0)
    kx, kfm, kw, kb, kpi = jax.random.split(key, 5)

    x = jax.random.normal(kx, (B, F), jnp.float32)

    # one-hot random feature-selection matrices (dNDF feature_mask), per tree
    fm = np.zeros((n_tree, F, U), np.float32)
    sel_idx = np.asarray(jax.random.randint(kfm, (n_tree, U), 0, F))
    for t in range(n_tree):
        for u in range(U):
            fm[t, sel_idx[t, u], u] = 1.0
    fm = jnp.asarray(fm)

    w = jax.random.normal(kw, (n_tree, U, L), jnp.float32) * 0.1
    b = jax.random.normal(kb, (n_tree, 1, L), jnp.float32) * 0.1
    pi = jax.nn.softmax(jax.random.normal(kpi, (n_tree, L, n_class),
                                          jnp.float32), axis=-1)

    params = prepare_forest(fm, w, b, pi, depth)   # one-time, off the hot path
    out = forest_forward(x, params)
    out = jax.block_until_ready(out)

    ref = forest_reference(x, fm, w, b, pi, depth)
    # bf16 streaming of x / fused W bounds the error around ~1e-3.
    np.testing.assert_allclose(np.asarray(out), np.asarray(ref),
                               rtol=1e-2, atol=1e-2)

    # TODO(synk): training-mode `tree.mu_cache.append(mu)` side effect and the
    # unused `save_flag` / `wavelets` args are not modeled (inference path).
    print("KERNEL_OK")
</pallas_src>

<mosaic_0001>
module attributes {stable_mosaic.version = 11 : i64} {
  func.func @_forest_kernel(%arg0: i32, %arg1: memref<2x128xbf16, #tpu.memory_space<vmem>>, %arg2: memref<128x128xbf16, #tpu.memory_space<vmem>>, %arg3: memref<1x128xf32, #tpu.memory_space<vmem>>, %arg4: memref<384x128xf32, #tpu.memory_space<vmem>>, %arg5: memref<3x128xf32, #tpu.memory_space<vmem>>, %arg6: memref<128x16xf32, #tpu.memory_space<vmem>>, %arg7: memref<2x16xf32, #tpu.memory_space<vmem>>) attributes {dimension_semantics = [#tpu.dimension_semantics<parallel>], iteration_bounds = array<i64: 1>, scalar_prefetch = 0 : i64, scratch_operands = 0 : i64, tpu.core_type = #tpu.core_type<tc>, window_params = [{transform_indices = @transform_0, window_bounds = array<i64: 2, 128>}, {pipeline_mode = #tpu.pipeline_mode<synchronous>, transform_indices = @transform_1, window_bounds = array<i64: 128, 128>}, {pipeline_mode = #tpu.pipeline_mode<synchronous>, transform_indices = @transform_2, window_bounds = array<i64: 1, 128>}, {pipeline_mode = #tpu.pipeline_mode<synchronous>, transform_indices = @transform_3, window_bounds = array<i64: 384, 128>}, {pipeline_mode = #tpu.pipeline_mode<synchronous>, transform_indices = @transform_4, window_bounds = array<i64: 3, 128>}, {pipeline_mode = #tpu.pipeline_mode<synchronous>, transform_indices = @transform_5, window_bounds = array<i64: 128, 16>}, {transform_indices = @transform_6, window_bounds = array<i64: 2, 16>}]} {
    %c0 = arith.constant 0 : index
    %c0_0 = arith.constant 0 : index
    %0 = vector.load %arg1[%c0, %c0_0] : memref<2x128xbf16, #tpu.memory_space<vmem>>, vector<2x128xbf16>
    %c0_1 = arith.constant 0 : index
    %c0_2 = arith.constant 0 : index
    %1 = vector.load %arg2[%c0_1, %c0_2] : memref<128x128xbf16, #tpu.memory_space<vmem>>, vector<128x128xbf16>
    %cst = arith.constant dense<0.000000e+00> : vector<2x128xf32>
    %2 = tpu.matmul %0, %1, %cst {dimension_numbers = #tpu.dot_dimension_numbers<[1], [0], [0], [1], [0, 0, 1, 1], [], []>} : vector<2x128xbf16>, vector<128x128xbf16>, vector<2x128xf32> -> vector<2x128xf32>
    %c0_3 = arith.constant 0 : index
    %c0_4 = arith.constant 0 : index
    %3 = vector.load %arg3[%c0_3, %c0_4] : memref<1x128xf32, #tpu.memory_space<vmem>>, vector<1x128xf32>
    %4 = vector.broadcast %3 : vector<1x128xf32> to vector<2x128xf32>
    %5 = arith.addf %2, %4 : vector<2x128xf32>
    %6 = arith.negf %5 : vector<2x128xf32>
    %7 = math.exp %6 : vector<2x128xf32>
    %cst_5 = arith.constant 1.000000e+00 : f32
    %8 = vector.broadcast %cst_5 : f32 to vector<2x128xf32>
    %9 = arith.addf %8, %7 : vector<2x128xf32>
    %10 = arith.divf %8, %9 : vector<2x128xf32>
    %c0_6 = arith.constant 0 : index
    %c0_7 = arith.constant 0 : index
    %11 = vector.load %arg5[%c0_6, %c0_7] : memref<3x128xf32, #tpu.memory_space<vmem>>, vector<3x128xf32>
    %c0_8 = arith.constant 0 : index
    %c0_9 = arith.constant 0 : index
    %12 = vector.load %arg4[%c0_8, %c0_9] : memref<384x128xf32, #tpu.memory_space<vmem>>, vector<128x128xf32>
    %cst_10 = arith.constant dense<0.000000e+00> : vector<2x128xf32>
    %13 = tpu.matmul %10, %12, %cst_10 {dimension_numbers = #tpu.dot_dimension_numbers<[1], [0], [0], [1], [0, 0, 1, 1], [], []>} : vector<2x128xf32>, vector<128x128xf32>, vector<2x128xf32> -> vector<2x128xf32>
    %14 = vector.extract_strided_slice %11 {offsets = [0, 0], sizes = [1, 128], strides = [1, 1]} : vector<3x128xf32> to vector<1x128xf32>
    %15 = vector.broadcast %14 : vector<1x128xf32> to vector<2x128xf32>
    %16 = arith.addf %13, %15 : vector<2x128xf32>
    %c128 = arith.constant 128 : index
    %c0_11 = arith.constant 0 : index
    %17 = vector.load %arg4[%c128, %c0_11] : memref<384x128xf32, #tpu.memory_space<vmem>>, vector<128x128xf32>
    %cst_12 = arith.constant dense<0.000000e+00> : vector<2x128xf32>
    %18 = tpu.matmul %10, %17, %cst_12 {dimension_numbers = #tpu.dot_dimension_numbers<[1], [0], [0], [1], [0, 0, 1, 1], [], []>} : vector<2x128xf32>, vector<128x128xf32>, vector<2x128xf32> -> vector<2x128xf32>
    %19 = vector.extract_strided_slice %11 {offsets = [1, 0], sizes = [1, 128], strides = [1, 1]} : vector<3x128xf32> to vector<1x128xf32>
    %20 = vector.broadcast %19 : vector<1x128xf32> to vector<2x128xf32>
    %21 = arith.addf %18, %20 : vector<2x128xf32>
    %22 = arith.mulf %16, %21 : vector<2x128xf32>
    %c256 = arith.constant 256 : index
    %c0_13 = arith.constant 0 : index
    %23 = vector.load %arg4[%c256, %c0_13] : memref<384x128xf32, #tpu.memory_space<vmem>>, vector<128x128xf32>
    %cst_14 = arith.constant dense<0.000000e+00> : vector<2x128xf32>
    %24 = tpu.matmul %10, %23, %cst_14 {dimension_numbers = #tpu.dot_dimension_numbers<[1], [0], [0], [1], [0, 0, 1, 1], [], []>} : vector<2x128xf32>, vector<128x128xf32>, vector<2x128xf32> -> vector<2x128xf32>
    %25 = vector.extract_strided_slice %11 {offsets = [2, 0], sizes = [1, 128], strides = [1, 1]} : vector<3x128xf32> to vector<1x128xf32>
    %26 = vector.broadcast %25 : vector<1x128xf32> to vector<2x128xf32>
    %27 = arith.addf %24, %26 : vector<2x128xf32>
    %28 = arith.mulf %22, %27 : vector<2x128xf32>
    %c0_15 = arith.constant 0 : index
    %c0_16 = arith.constant 0 : index
    %29 = vector.load %arg6[%c0_15, %c0_16] : memref<128x16xf32, #tpu.memory_space<vmem>>, vector<128x16xf32>
    %cst_17 = arith.constant dense<0.000000e+00> : vector<2x16xf32>
    %30 = tpu.matmul %28, %29, %cst_17 {dimension_numbers = #tpu.dot_dimension_numbers<[1], [0], [0], [1], [0, 0, 1, 1], [], []>} : vector<2x128xf32>, vector<128x16xf32>, vector<2x16xf32> -> vector<2x16xf32>
    %c0_18 = arith.constant 0 : index
    %c0_19 = arith.constant 0 : index
    %31 = vector.load %arg7[%c0_18, %c0_19] : memref<2x16xf32, #tpu.memory_space<vmem>>, vector<2x16xf32>
    tpu.vector_store %arg7[%c0_18, %c0_19], %30 {strides = array<i32>} : memref<2x16xf32, #tpu.memory_space<vmem>>, vector<2x16xf32>,
    return
  }
  func.func @transform_0(%arg0: i32) -> (i32, i32) {
    %c0_i32 = arith.constant 0 : i32
    %c0_i32_0 = arith.constant 0 : i32
    return %arg0, %c0_i32 : i32, i32
  }
  func.func @transform_1(%arg0: i32) -> (i32, i32) {
    %c0_i32 = arith.constant 0 : i32
    %c0_i32_0 = arith.constant 0 : i32
    %c0_i32_1 = arith.constant 0 : i32
    return %c0_i32, %c0_i32_0 : i32, i32
  }
  func.func @transform_2(%arg0: i32) -> (i32, i32) {
    %c0_i32 = arith.constant 0 : i32
    %c0_i32_0 = arith.constant 0 : i32
    %c0_i32_1 = arith.constant 0 : i32
    return %c0_i32, %c0_i32_0 : i32, i32
  }
  func.func @transform_3(%arg0: i32) -> (i32, i32) {
    %c0_i32 = arith.constant 0 : i32
    %c0_i32_0 = arith.constant 0 : i32
    %c0_i32_1 = arith.constant 0 : i32
    return %c0_i32, %c0_i32_0 : i32, i32
  }
  func.func @transform_4(%arg0: i32) -> (i32, i32) {
    %c0_i32 = arith.constant 0 : i32
    %c0_i32_0 = arith.constant 0 : i32
    %c0_i32_1 = arith.constant 0 : i32
    return %c0_i32, %c0_i32_0 : i32, i32
  }
  func.func @transform_5(%arg0: i32) -> (i32, i32) {
    %c0_i32 = arith.constant 0 : i32
    %c0_i32_0 = arith.constant 0 : i32
    %c0_i32_1 = arith.constant 0 : i32
    return %c0_i32, %c0_i32_0 : i32, i32
  }
  func.func @transform_6(%arg0: i32) -> (i32, i32) {
    %c0_i32 = arith.constant 0 : i32
    %c0_i32_0 = arith.constant 0 : i32
    return %arg0, %c0_i32 : i32, i32
  }
}

</mosaic_0001>

<bundles_post_ra>
// kernel: tpu_custom_call.1
= control target key start
LH: loop header
LB: loop body
LE: loop exit
PB: predicated region body
PF: predicated region fallthrough
CT: control target
= control target key end

     0   :  { %11 = vsyncpa [#allocation3], 0  ;;  %s1140_s0 = inlined_call_operand.vmem [shape: bf16[2,128], index: 0, kind: input, shape index: {}]   ;;  %s1141_s1 = inlined_call_operand.vmem [shape: bf16[128,128], index: 1, kind: input, shape index: {}]   ;;  %s1142_s2 = inlined_call_operand.vmem [shape: f32[1,128], index: 2, kind: input, shape index: {}]   ;;  %s1143_s3 = inlined_call_operand.hbm [shape: f32[384,128], index: 3, kind: input, shape index: {}]   ;;  %s1144_s4 = inlined_call_operand.vmem [shape: f32[3,128], index: 4, kind: input, shape index: {}]   ;;  %s1145_s5 = inlined_call_operand.vmem [shape: f32[128,16], index: 5, kind: input, shape index: {}]   ;;  %s1146_s6 = inlined_call_operand.hbm [shape: f32[2,16], index: 6, kind: output, shape index: {}]  }
   0x1   :  { %12 = vsyncpa [#allocation4], 0  ;;  %s943_s21 = smov [#allocation2]   ;;  %s895_s25 = scalar_lea.hbm %s1143_s3, 6144 }
   0x2   :  { %s24_s22 = sshll.u32 %s943_s21, 4  ;;  %p896_p0 = scmp.ne.s32.totalorder %s1143_s3, %s895_s25  ;;  %s25_s22 = int_to_ptr.vmem [resolvable:$true] %s24_s22 }
   0x3   :  { %p899_p1 = scmp.lt.u32.totalorder %s895_s25, %s1143_s3 }
   0x5   :  { %p901_p2 = pnand %p899_p1, %p896_p0 }
   0x7   :  { %904 = shalt.err (!%p901_p2)
}
   0x8   :  { %s905_s30 = scalar_lea.vmem %s25_s22, 6144  ;;  %p910_p4 = scmp.lt.s32.totalorder %s25_s22, %s25_s22 }
   0x9   :  { %p906_p3 = scmp.ne.s32.totalorder %s25_s22, %s905_s30  ;;  %p911_p5 = scmp.lt.s32.totalorder %s905_s30, %s905_s30 }
   0xb   :  { %p912_p6 = por %p911_p5, %p910_p4 }
   0xd   :  { %p913_p7 = pnand %p912_p6, %p906_p3 }
   0xf   :  { %916 = shalt.err (!%p913_p7)
}
  0x10   :  { %s944_s7 = smov 128   ;;  %s945_s8 = smov 8  }
  0x11   :  { %30 = dma.hbm_to_vmem [thread:$0]  %s1143_s3, 6144, %s25_s22, [#allocation3], %s944_s7, %s944_s7, %s945_s8  }
  0x12   :  { %939 = dma.done.wait [#allocation3], 6144  }
  0x13   :  { %940 = vsyncadd [#allocation3], 4294961152  ;;  %v946_v0 = vmov 0.0   ;;  %vm947_vm0 = vmmov 0   ;;  %v948_v1 = vmov 0.0|0.0   ;;  %v883_v2 = vld [vmem:[%s1141_s1] sm:$0xff]  }
  0x14   :  { %620 = vmatprep.subr.bf16.mxu0 %v946_v0  ;;  %636 = vmatprep.mubr.msk.bf16.mxu0 %vm947_vm0, %v946_v0  ;;  %v884_v3 = vld [vmem:[%s1141_s1 + $0x8] sm:$0xff]   ;;  %v885_v4 = vld [vmem:[%s1141_s1 + $0x10] sm:$0xff]   ;;  %v158_v5 = vld [vmem:[#allocation2] sm:$0xff]  ;;  %vm516_vm1 = vcmask 123904  }
  0x15   :  { %780 = vmatprep.subr.bf16.mxu1 %v948_v1  ;;  %672 = vmatprep.mubr.msk.f32.mxu1 %vm947_vm0, %v946_v0  ;;  %v159_v6 = vld [vmem:[#allocation2 + $0x8] sm:$0xff]  ;;  %v886_v8 = vld [vmem:[%s1141_s1 + $0x18] sm:$0xff]   ;;  %v887_v9 = vld [vmem:[%s1141_s1 + $0x20] sm:$0xff]  }
  0x16   :  { %621 = vmatpush3.bf16.msra.mxu0 %v883_v2  ;;  %v781_v7 = vpack.c.bf16 %v159_v6, %v158_v5  ;;  %v888_v10 = vld [vmem:[%s1141_s1 + $0x28] sm:$0xff]   ;;  %v889_v11 = vld [vmem:[%s1141_s1 + $0x30] sm:$0xff]   ;;  %v890_v12 = vld [vmem:[%s1141_s1 + $0x38] sm:$0xff]  }
  0x17   :  { %622 = vmatprep.subr.bf16.mxu0 %v946_v0  ;;  %v248_v13 = vld [vmem:[#allocation2 + $0x80] sm:$0xff]  ;;  %v249_v14 = vld [vmem:[#allocation2 + $0x88] sm:$0xff]  ;;  %v160_v17 = vld [vmem:[#allocation2 + $0x10] sm:$0xff] }
  0x18   :  { %782 = vmatpush3.bf16.msra.mxu1 %v781_v7  ;;  %v39_v15 = vld [vmem:[%s1140_s0] sm:$0x1]  ;;  %v805_v16 = vpack.c.bf16 %v249_v14, %v248_v13  ;;  %v161_v18 = vld [vmem:[#allocation2 + $0x18] sm:$0xff]  ;;  %v250_v20 = vld [vmem:[#allocation2 + $0x90] sm:$0xff] }
  0x19   :  { %783 = vmatprep.subr.bf16.mxu1 %v948_v1  ;;  %v784_v19 = vpack.c.bf16 %v161_v18, %v160_v17  ;;  %v251_v21 = vld [vmem:[#allocation2 + $0x98] sm:$0xff]  ;;  %v162_v23 = vld [vmem:[#allocation2 + $0x20] sm:$0xff]  ;;  %v163_v24 = vld [vmem:[#allocation2 + $0x28] sm:$0xff] }
  0x1a   :  { %623 = vmatpush3.bf16.msra.mxu0 %v884_v3  ;;  %v808_v22 = vpack.c.bf16 %v251_v21, %v250_v20  ;;  %v787_v25 = vpack.c.bf16 %v163_v24, %v162_v23  ;;  %v252_v26 = vld [vmem:[#allocation2 + $0xa0] sm:$0xff]  ;;  %v253_v27 = vld [vmem:[#allocation2 + $0xa8] sm:$0xff]  ;;  %v164_v29 = vld [vmem:[#allocation2 + $0x30] sm:$0xff] }
  0x1b   :  { %624 = vmatprep.subr.bf16.mxu0 %v946_v0  ;;  %v811_v28 = vpack.c.bf16 %v253_v27, %v252_v26  ;;  %v165_v30 = vld [vmem:[#allocation2 + $0x38] sm:$0xff]  ;;  %v254_v32 = vld [vmem:[#allocation2 + $0xb0] sm:$0xff]  ;;  %v166_v35 = vld [vmem:[#allocation2 + $0x40] sm:$0xff] }
  0x1c   :  { %785 = vmatpush3.bf16.msra.mxu1 %v784_v19  ;;  %v790_v31 = vpack.c.bf16 %v165_v30, %v164_v29  ;;  %v255_v33 = vld [vmem:[#allocation2 + $0xb8] sm:$0xff]  ;;  %v167_v36 = vld [vmem:[#allocation2 + $0x48] sm:$0xff]  ;;  %v256_v38 = vld [vmem:[#allocation2 + $0xc0] sm:$0xff] }
  0x1d   :  { %786 = vmatprep.subr.bf16.mxu1 %v948_v1  ;;  %v814_v34 = vpack.c.bf16 %v255_v33, %v254_v32  ;;  %v793_v37 = vpack.c.bf16 %v167_v36, %v166_v35  ;;  %v257_v39 = vld [vmem:[#allocation2 + $0xc8] sm:$0xff]  ;;  %v168_v41 = vld [vmem:[#allocation2 + $0x50] sm:$0xff]  ;;  %v169_v42 = vld [vmem:[#allocation2 + $0x58] sm:$0xff] }
  0x1e   :  { %625 = vmatpush3.bf16.msra.mxu0 %v885_v4  ;;  %v817_v40 = vpack.c.bf16 %v257_v39, %v256_v38  ;;  %v796_v43 = vpack.c.bf16 %v169_v42, %v168_v41  ;;  %v258_v44 = vld [vmem:[#allocation2 + $0xd0] sm:$0xff]  ;;  %v259_v45 = vld [vmem:[#allocation2 + $0xd8] sm:$0xff]  ;;  %v170_v47 = vld [vmem:[#allocation2 + $0x60] sm:$0xff] }
  0x1f   :  { %626 = vmatprep.subr.bf16.mxu0 %v946_v0  ;;  %v820_v46 = vpack.c.bf16 %v259_v45, %v258_v44  ;;  %v171_v48 = vld [vmem:[#allocation2 + $0x68] sm:$0xff]  ;;  %v260_v49 = vld [vmem:[#allocation2 + $0xe0] sm:$0xff]  ;;  %v172_v52 = vld [vmem:[#allocation2 + $0x70] sm:$0xff] }
  0x20   :  { %788 = vmatpush3.bf16.msra.mxu1 %v787_v25  ;;  %v799_v50 = vpack.c.bf16 %v171_v48, %v170_v47  ;;  %v261_v51 = vld [vmem:[#allocation2 + $0xe8] sm:$0xff]  ;;  %v173_v53 = vld [vmem:[#allocation2 + $0x78] sm:$0xff]  ;;  %v262_v55 = vld [vmem:[#allocation2 + $0xf0] sm:$0xff] }
  0x21   :  { %789 = vmatprep.subr.bf16.mxu1 %v948_v1  ;;  %v823_v54 = vpack.c.bf16 %v261_v51, %v260_v49  ;;  %v263_v56 = vld [vmem:[#allocation2 + $0xf8] sm:$0xff]  ;;  %v802_v57 = vpack.c.bf16 %v173_v53, %v172_v52  ;;  %v533_v59 = vld [vmem:[%s1142_s2] ss:$0 sm:$0xff]  ;;  %v340_v7 = vld [vmem:[#allocation2 + $0x108] sm:$0xff] }
  0x22   :  { %627 = vmatpush3.bf16.msra.mxu0 %v886_v8  ;;  %v826_v58 = vpack.c.bf16 %v263_v56, %v262_v55  ;;  %v339_v6 = vld [vmem:[#allocation2 + $0x100] sm:$0xff]  ;;  %v344_v14 = vld [vmem:[#allocation2 + $0x128] sm:$0xff]  ;;  %v346_v17 = vld [vmem:[#allocation2 + $0x138] sm:$0xff] }
  0x23   :  { %628 = vmatprep.subr.bf16.mxu0 %v946_v0  ;;  %v829_v8 = vpack.c.bf16 %v340_v7, %v339_v6  ;;  %v343_v13 = vld [vmem:[#allocation2 + $0x120] sm:$0xff]  ;;  %v348_v20 = vld [vmem:[#allocation2 + $0x148] sm:$0xff]  ;;  %v350_v23 = vld [vmem:[#allocation2 + $0x158] sm:$0xff] }
  0x24   :  { %791 = vmatpush3.bf16.msra.mxu1 %v790_v31  ;;  %v347_v19 = vld [vmem:[#allocation2 + $0x140] sm:$0xff]  ;;  %v352_v25 = vld [vmem:[#allocation2 + $0x168] sm:$0xff]  ;;  %v353_v27 = vld [vmem:[#allocation2 + $0x170] sm:$0xff] }
  0x25   :  { %792 = vmatprep.subr.bf16.mxu1 %v948_v1  ;;  %v841_v21 = vpack.c.bf16 %v348_v20, %v347_v19  ;;  %v351_v24 = vld [vmem:[#allocation2 + $0x160] sm:$0xff]  ;;  %v431_v31 = vld [vmem:[%s1145_s5 + $0x8] sm:$0xff]  ;;  %v432_v32 = vld [vmem:[%s1145_s5 + $0x10] sm:$0xff] }
  0x26   :  { %629 = vmatpush3.bf16.msra.mxu0 %v887_v9  ;;  %v341_v9 = vld [vmem:[#allocation2 + $0x110] sm:$0xff]  ;;  %v847_v26 = vpack.c.bf16 %v352_v25, %v351_v24  ;;  %v430_v30 = vld [vmem:[%s1145_s5] sm:$0xff]  ;;  %v443_v49 = vld [vmem:[%s1145_s5 + $0x68] sm:$0xff] }
  0x27   :  { %630 = vmatprep.subr.bf16.mxu0 %v946_v0  ;;  %v853_v33 = vpack.c.bf16 %v431_v31, %v430_v30  ;;  %v434_v36 = vld [vmem:[%s1145_s5 + $0x20] sm:$0xff]  ;;  %v436_v39 = vld [vmem:[%s1145_s5 + $0x30] sm:$0xff]  ;;  %v445_v52 = vld [vmem:[%s1145_s5 + $0x78] sm:$0xff] }
  0x28   :  { %794 = vmatpush3.bf16.msra.mxu1 %v793_v37  ;;  %v435_v37 = vld [vmem:[%s1145_s5 + $0x28] sm:$0xff]  ;;  %v438_v42 = vld [vmem:[%s1145_s5 + $0x40] sm:$0xff]  ;;  %v440_v45 = vld [vmem:[%s1145_s5 + $0x50] sm:$0xff] }
  0x29   :  { %795 = vmatprep.subr.bf16.mxu1 %v948_v1  ;;  %v859_v38 = vpack.c.bf16 %v435_v37, %v434_v36  ;;  %v442_v48 = vld [vmem:[%s1145_s5 + $0x60] sm:$0xff]  ;;  %v444_v51 = vld [vmem:[%s1145_s5 + $0x70] sm:$0xff] }
  0x2a   :  { %631 = vmatpush3.bf16.msra.mxu0 %v888_v10  ;;  %v342_v10 = vld [vmem:[#allocation2 + $0x118] sm:$0xff]  ;;  %v874_v53 = vpack.c.bf16 %v445_v52, %v444_v51 }
  0x2b   :  { %632 = vmatprep.subr.bf16.mxu0 %v946_v0 }
  0x2c   :  { %797 = vmatpush3.bf16.msra.mxu1 %v796_v43  ;;  %v439_v43 = vld [vmem:[%s1145_s5 + $0x48] sm:$0xff] }
  0x2d   :  { %798 = vmatprep.subr.bf16.mxu1 %v948_v1  ;;  %v865_v44 = vpack.c.bf16 %v439_v43, %v438_v42 }
  0x2e   :  { %633 = vmatpush3.bf16.msra.mxu0 %v889_v11 }
  0x2f   :  { %634 = vmatprep.subr.bf16.mxu0 %v946_v0 }
  0x30   :  { %800 = vmatpush3.bf16.msra.mxu1 %v799_v50  ;;  %v871_v50 = vpack.c.bf16 %v443_v49, %v442_v48 }
  0x31   :  { %801 = vmatprep.subr.bf16.mxu1 %v948_v1 }
  0x32   :  { %635 = vmatpush3.bf16.msra.mxu0 %v890_v12  ;;  %v832_v12 = vpack.c.bf16 %v342_v10, %v341_v9 }
  0x33   :  { %804 = vmatprep.subr.bf16.mxu0 %v948_v1 }
  0x34   :  { %803 = vmatpush3.bf16.msra.mxu1 %v802_v57 }
  0x35   :  { %637 = vmatmul.mubr.bf16.vlgmr.msra.gmra.mrb[0].mxu0 %v39_v15  ;;  %828 = vmatprep.subr.bf16.mxu1 %v948_v1  ;;  %v835_v15 = vpack.c.bf16 %v344_v14, %v343_v13 }
  0x36   :  { %806 = vmatpush3.bf16.msra.mxu0 %v805_v16  ;;  %707 = vmatprep.mubr.msk.f32.mxu0 %vm947_vm0, %v946_v0  ;;  %v345_v16 = vld [vmem:[#allocation2 + $0x130] sm:$0xff] }
  0x37   :  { %807 = vmatprep.subr.bf16.mxu0 %v948_v1  ;;  %v838_v18 = vpack.c.bf16 %v346_v17, %v345_v16 }
  0x3a   :  { %809 = vmatpush3.bf16.msra.mxu0 %v808_v22  ;;  %v349_v22 = vld [vmem:[#allocation2 + $0x150] sm:$0xff] }
  0x3b   :  { %810 = vmatprep.subr.bf16.mxu0 %v948_v1 }
  0x3e   :  { %812 = vmatpush3.bf16.msra.mxu0 %v811_v28  ;;  %v354_v28 = vld [vmem:[#allocation2 + $0x178] sm:$0xff] }
  0x3f   :  { %813 = vmatprep.subr.bf16.mxu0 %v948_v1  ;;  %v850_v29 = vpack.c.bf16 %v354_v28, %v353_v27 }
  0x42   :  { %815 = vmatpush3.bf16.msra.mxu0 %v814_v34  ;;  %v433_v34 = vld [vmem:[%s1145_s5 + $0x18] sm:$0xff] }
  0x43   :  { %816 = vmatprep.subr.bf16.mxu0 %v948_v1  ;;  %v856_v35 = vpack.c.bf16 %v433_v34, %v432_v32 }
  0x46   :  { %818 = vmatpush3.bf16.msra.mxu0 %v817_v40  ;;  %v437_v40 = vld [vmem:[%s1145_s5 + $0x38] sm:$0xff] }
  0x47   :  { %819 = vmatprep.subr.bf16.mxu0 %v948_v1  ;;  %v862_v41 = vpack.c.bf16 %v437_v40, %v436_v39 }
  0x4a   :  { %821 = vmatpush3.bf16.msra.mxu0 %v820_v46  ;;  %v441_v46 = vld [vmem:[%s1145_s5 + $0x58] sm:$0xff]  ;;  %s949_s5 = smov [#allocation5]  }
  0x4b   :  { %822 = vmatprep.subr.bf16.mxu0 %v948_v1  ;;  %v868_v47 = vpack.c.bf16 %v441_v46, %v440_v45  ;;  %s524_s9 = sshll.u32 %s949_s5, 4  ;;  %s525_s9 = int_to_ptr.vmem [resolvable:$true] %s524_s9 }
  0x4c   :  { %p922_p9 = scmp.lt.s32.totalorder %s525_s9, %s525_s9 }
  0x4e   :  { %824 = vmatpush3.bf16.msra.mxu0 %v823_v54  ;;  %v174_v54 = vlaneseq }
  0x4f   :  { %825 = vmatprep.subr.bf16.mxu0 %v948_v1 }
  0x50   :  { %v175_v55 = vshrl.u32 %v174_v54, 7 }
  0x52   :  { %827 = vmatpush3.bf16.msra.mxu0 %v826_v58  ;;  %v176_v56 = vsub.s32 0, %v175_v55  ;;  %v266_v57 = vsub.s32 1, %v175_v55  ;;  %v157_v58 = vld [vmem:[%s1144_s4] sm:$0x7]  ;;  %s917_s4 = scalar_lea.vmem %s525_s9, 32 }
  0x53   :  { %852 = vmatprep.subr.bf16.mxu0 %v948_v1  ;;  %p918_p8 = scmp.ne.s32.totalorder %s525_s9, %s917_s4  ;;  %p923_p10 = scmp.lt.s32.totalorder %s917_s4, %s917_s4 }
  0x55   :  { %p924_p11 = por %p923_p10, %p922_p9 }
  0x57   :  { %p925_p12 = pnand %p924_p11, %p918_p8 }
 0x108   :  { %v145_v60 = vpop.f32.mrb[0].mxu0 }
 0x109   :  { %v146_v61 = vadd.f32 %v533_v59, %v145_v60  ;;  %v638_v62 = vpop.f32.mrb[1].mxu0  ;;  %v177_v59 = vrot.slane %v157_v58, %v176_v56 }
 0x10a   :  { %v148_v63 = vpop.f32.mrb[2].mxu0 }
 0x10b   :  { %v542_v2 = vmul.f32 -1.442695, %v146_v61  ;;  %v639_v3 = vpop.f32.mrb[3].mxu0 }
 0x10d   :  { %891 = vpow2.f32 %v542_v2 }
 0x117   :  { %v892_v4 = vpop.eup %891 }
 0x118   :  { %v154_v5 = vadd.f32 1.0, %v892_v4 }
 0x11a   :  { %893 = vrcp.f32 %v154_v5  ;;  %v357_v5 = vsub.s32 2, %v175_v55 }
 0x11c   :  { %v358_v6 = vrot.slane %v157_v58, %v357_v5 }
 0x124   :  { %v894_v11 = vpop.eup %893 }
 0x125   :  { %673 = vmatmul.mubr.f32.vlgmr.msra.gmra.mrb[0].mxu1 %v894_v11  ;;  %708 = vmatmul.mubr.f32.vlgmr.msra.gmra.mrb[4].mxu0 %v894_v11 }
 0x126   :  { %830 = vmatpush3.bf16.msra.mxu1 %v829_v8  ;;  %742 = vmatprep.mubr.msk.f32.mxu1 %vm947_vm0, %v946_v0 }
 0x127   :  { %831 = vmatprep.subr.bf16.mxu1 %v948_v1  ;;  %777 = vmatprep.mubr.msk.f32.mxu0 %vm947_vm0, %v946_v0  ;;  %v844_v0 = vpack.c.bf16 %v350_v23, %v349_v22 }
 0x128   :  { %854 = vmatpush3.bf16.msra.mxu0 %v853_v33 }
 0x129   :  { %855 = vmatprep.subr.bf16.mxu0 %v948_v1 }
 0x12a   :  { %833 = vmatpush3.bf16.msra.mxu1 %v832_v12 }
 0x12b   :  { %834 = vmatprep.subr.bf16.mxu1 %v948_v1 }
 0x12c   :  { %857 = vmatpush3.bf16.msra.mxu0 %v856_v35 }
 0x12d   :  { %858 = vmatprep.subr.bf16.mxu0 %v948_v1 }
 0x12e   :  { %836 = vmatpush3.bf16.msra.mxu1 %v835_v15 }
 0x12f   :  { %837 = vmatprep.subr.bf16.mxu1 %v948_v1 }
 0x130   :  { %860 = vmatpush3.bf16.msra.mxu0 %v859_v38 }
 0x131   :  { %861 = vmatprep.subr.bf16.mxu0 %v948_v1 }
 0x132   :  { %839 = vmatpush3.bf16.msra.mxu1 %v838_v18 }
 0x133   :  { %840 = vmatprep.subr.bf16.mxu1 %v948_v1 }
 0x134   :  { %863 = vmatpush3.bf16.msra.mxu0 %v862_v41 }
 0x135   :  { %864 = vmatprep.subr.bf16.mxu0 %v948_v1 }
 0x136   :  { %842 = vmatpush3.bf16.msra.mxu1 %v841_v21 }
 0x137   :  { %843 = vmatprep.subr.bf16.mxu1 %v948_v1 }
 0x138   :  { %866 = vmatpush3.bf16.msra.mxu0 %v865_v44 }
 0x139   :  { %867 = vmatprep.subr.bf16.mxu0 %v948_v1 }
 0x13a   :  { %845 = vmatpush3.bf16.msra.mxu1 %v844_v0 }
 0x13b   :  { %846 = vmatprep.subr.bf16.mxu1 %v948_v1 }
 0x13c   :  { %869 = vmatpush3.bf16.msra.mxu0 %v868_v47 }
 0x13d   :  { %870 = vmatprep.subr.bf16.mxu0 %v948_v1 }
 0x13e   :  { %848 = vmatpush3.bf16.msra.mxu1 %v847_v26 }
 0x13f   :  { %849 = vmatprep.subr.bf16.mxu1 %v948_v1 }
 0x140   :  { %872 = vmatpush3.bf16.msra.mxu0 %v871_v50 }
 0x141   :  { %873 = vmatprep.subr.bf16.mxu0 %v948_v1  ;;  %v267_v1 = vrot.slane %v157_v58, %v266_v57 }
 0x142   :  { %851 = vmatpush3.bf16.msra.mxu1 %v850_v29 }
 0x144   :  { %875 = vmatpush3.bf16.msra.mxu0 %v874_v53 }
 0x145   :  { %743 = vmatmul.mubr.f32.vlgmr.msra.gmra.mrb[2].mxu1 %v894_v11 }
 0x1f8   :  { %v244_v60 = vpop.f32.mrb[0].mxu1  ;;  %v334_v61 = vpop.f32.mrb[4].mxu0 }
 0x1f9   :  { %v245_v62 = vadd.f32 %v244_v60, %v177_v59  ;;  %v335_v63 = vadd.f32 %v334_v61, %v267_v1  ;;  %v674_v2 = vpop.f32.mrb[1].mxu1  ;;  %v709_v3 = vpop.f32.mrb[5].mxu0 }
 0x1fb   :  { %v338_v4 = vmul.f32 %v335_v63, %v245_v62 }
 0x218   :  { %v425_v7 = vpop.f32.mrb[2].mxu1 }
 0x219   :  { %v426_v8 = vadd.f32 %v425_v7, %v358_v6  ;;  %v744_v9 = vpop.f32.mrb[3].mxu1 }
 0x21b   :  { %v429_v10 = vmul.f32 %v426_v8, %v338_v4 }
 0x21d   :  { %778 = vmatmul.mubr.f32.vlgmr.msra.gmra.mrb[6].mxu0 %v429_v10 }
 0x2f0   :  { %v512_v11 = vpop.f32.mrb[6].mxu0 }
 0x2f1   :  { %v779_v12 = vpop.f32.mrb[7].mxu0  ;;  %517 = vst.msk [vmem:[#allocation5] sm:$0x3] %vm516_vm1, %v512_v11 }
 0x2f2   :  { %928 = shalt.err (!%p925_p12)
}
 0x2f3   :  { %s929_s12 = scalar_lea.hbm %s1146_s6, 32 }
 0x2f4   :  { %p930_p13 = scmp.ne.s32.totalorder %s1146_s6, %s929_s12  ;;  %p933_p0 = scmp.lt.u32.totalorder %s929_s12, %s1146_s6 }
 0x2f6   :  { %p935_p1 = pnand %p933_p0, %p930_p13 }
 0x2f8   :  { %938 = shalt.err (!%p935_p1)
}
 0x2f9   :  { %527 = dma.vmem_to_hbm [thread:$0]  %s525_s9, 32, %s1146_s6, [#allocation4]  }
 0x2fa   :  { %941 = dma.done.wait [#allocation4], 32  }
 0x2fb   :  { %942 = vsyncadd [#allocation4], 4294967264 }
 0x2fc   :  { %531 = vsyncpa [#allocation3], 1 }
 0x2fd   :  { %532 = vsyncpa [#allocation4], 1 }

</bundles_post_ra>
